<compile_context>
chip_gen: v7x
topology: tpu7x:2x2x1
jax: 0.10.0
libtpu: 0.0.40
codegen_flags: <defaults>
</compile_context>

<pallas_src>
import numpy as np
import jax
import jax.numpy as jnp
from jax.experimental import pallas as pl
from jax.experimental.pallas import tpu as pltpu


def ensemble_kernel(x_ref, w_ref, b_ref, out_ref):
    """Fully fused ensemble forward for one batch tile.

    x_ref  : (TB, D)  input features
    w_ref  : (D, 2)   fused weights  [W_base @ ens_w | W_base @ W_meta]
    b_ref  : (1, 2)   fused biases   [b_base @ ens_w | b_base @ W_meta + b_meta]
    out_ref: (TB, 2)  col 0 = combined ensemble output, col 1 = meta-learner output
    """
    out_ref[...] = (
        jnp.dot(x_ref[...], w_ref[...], preferred_element_type=jnp.float32)
        + b_ref[...]
    )


def pack_ensemble_params(W_base, b_base, W_meta, b_meta, ens_weights_base):
    """Hoisted (call-once) parameter packing / algebraic fusion.

    W_base          : (D, K)  stacked base-model weights
    b_base          : (1, K)  stacked base-model biases
    W_meta, b_meta  : (K, 1), (1, 1)  meta-learner ('meta_lr') params
    ens_weights_base: (K, 1)  normalized ensemble weights of the base models only
                      (meta weight lookup raises IndexError in the reference and
                       is skipped, so the meta output never enters the combination)
    """
    s = jnp.concatenate([ens_weights_base, W_meta], axis=1)            # (K, 2)
    W_fused = (W_base @ s).astype(jnp.float32)                         # (D, 2)
    b_fused = (b_base @ s
               + jnp.concatenate([jnp.zeros((1, 1), jnp.float32), b_meta],
                                 axis=1)).astype(jnp.float32)          # (1, 2)
    return W_fused, b_fused


def ensemble_forward(x, W_fused, b_fused, *, block_b=4096):
    """Returns (combined, meta); the PyTorch module's forward() returns only `combined`."""
    B, D = x.shape

    if B <= block_b:
        # Small/medium batch: single shot, fully VMEM-resident, no grid machinery.
        vmem = pl.BlockSpec(memory_space=pltpu.MemorySpace.VMEM)
        out = pl.pallas_call(
            ensemble_kernel,
            out_shape=jax.ShapeDtypeStruct((B, 2), jnp.float32),
            in_specs=[vmem, vmem, vmem],
            out_specs=vmem,
        )(x, W_fused, b_fused)
    else:
        # Large batch: tile the batch dim over the ORIGINAL x (no pad pass);
        # Pallas masks out-of-bounds writes on the ragged last block.
        # Fused params pinned to block (0, 0) -> stay VMEM-resident across steps.
        # Batch axis "parallel" lets v7x's 2 TensorCores split the grid.
        nb = pl.cdiv(B, block_b)
        out = pl.pallas_call(
            ensemble_kernel,
            out_shape=jax.ShapeDtypeStruct((B, 2), jnp.float32),
            grid=(nb,),
            in_specs=[
                pl.BlockSpec((block_b, D), lambda i: (i, 0)),
                pl.BlockSpec((D, 2), lambda i: (0, 0)),
                pl.BlockSpec((1, 2), lambda i: (0, 0)),
            ],
            out_specs=pl.BlockSpec((block_b, 2), lambda i: (i, 0)),
            compiler_params=pltpu.CompilerParams(
                dimension_semantics=("parallel",)),
        )(x, W_fused, b_fused)

    combined = out[:, 0:1]   # the module's forward returns only this
    meta = out[:, 1:2]       # computed (as in the reference), excluded from combination
    return combined, meta


def reference_forward(x, W_base, b_base, W_meta, b_meta, ens_weights_base):
    """Plain-JAX reference mirroring the PyTorch forward (for sanity check)."""
    base = x @ W_base + b_base                  # (B, K)
    meta = base @ W_meta + b_meta               # computed, then dropped (IndexError path)
    combined = base @ ens_weights_base          # (B, 1)
    return combined, meta


if __name__ == "__main__":
    B, D, K = 8, 32, 4   # batch, input features, number of base models

    key = jax.random.PRNGKey(0)
    kx, kwb, kbb, kwm, kbm, kw = jax.random.split(key, 6)

    x = jax.random.normal(kx, (B, D), dtype=jnp.float32)

    # Deterministic parameter init (synthetic; shapes from the module structure).
    W_base = jax.random.normal(kwb, (D, K), dtype=jnp.float32) * 0.1   # K base nn.Linear(D, 1)
    b_base = jax.random.normal(kbb, (1, K), dtype=jnp.float32) * 0.1
    W_meta = jax.random.normal(kwm, (K, 1), dtype=jnp.float32) * 0.1   # meta_lr: nn.Linear(K, 1)
    b_meta = jax.random.normal(kbm, (1, 1), dtype=jnp.float32) * 0.1

    # Ensemble weights over len(models) = K + 1 entries, normalized (as in __init__).
    raw_weights = jax.random.uniform(kw, (K + 1,), dtype=jnp.float32) + 0.1
    ens_weights = raw_weights / raw_weights.sum()
    # Only base-model weights participate in the combination (meta index lookup
    # raises IndexError in the reference and is skipped).
    ens_weights_base = ens_weights[:K].reshape(K, 1)

    # Pack / fuse parameters ONCE (hoisted out of the forward pass).
    W_fused, b_fused = pack_ensemble_params(W_base, b_base, W_meta, b_meta,
                                            ens_weights_base)
    W_fused = jax.block_until_ready(W_fused)
    b_fused = jax.block_until_ready(b_fused)

    # --- small-batch (grid-free, fully VMEM-resident) path ---
    combined, meta = ensemble_forward(x, W_fused, b_fused)
    combined = jax.block_until_ready(combined)
    meta = jax.block_until_ready(meta)

    ref_comb, ref_meta = reference_forward(x, W_base, b_base, W_meta, b_meta,
                                           ens_weights_base)
    assert combined.shape == (B, 1) and meta.shape == (B, 1)
    assert np.allclose(np.asarray(combined), np.asarray(ref_comb), atol=1e-4, rtol=1e-4)
    assert np.allclose(np.asarray(meta), np.asarray(ref_meta), atol=1e-4, rtol=1e-4)

    # --- batch-tiled path (ragged last block, no pad pass, weights pinned) ---
    B2 = 2500                       # not a multiple of block_b -> exercises masked writes
    x2 = jax.random.normal(jax.random.PRNGKey(1), (B2, D), dtype=jnp.float32)
    comb2, meta2 = ensemble_forward(x2, W_fused, b_fused, block_b=1024)
    comb2 = jax.block_until_ready(comb2)
    meta2 = jax.block_until_ready(meta2)
    ref2_comb, ref2_meta = reference_forward(x2, W_base, b_base, W_meta, b_meta,
                                             ens_weights_base)
    assert comb2.shape == (B2, 1) and meta2.shape == (B2, 1)
    assert np.allclose(np.asarray(comb2), np.asarray(ref2_comb), atol=1e-4, rtol=1e-4)
    assert np.allclose(np.asarray(meta2), np.asarray(ref2_meta), atol=1e-4, rtol=1e-4)

    print("KERNEL_OK")
</pallas_src>

<mosaic_0001>
module attributes {stable_mosaic.version = 11 : i64} {
  func.func @ensemble_kernel(%arg0: memref<8x32xf32, #tpu.memory_space<vmem>>, %arg1: memref<32x2xf32, #tpu.memory_space<vmem>>, %arg2: memref<1x2xf32, #tpu.memory_space<vmem>>, %arg3: memref<8x2xf32, #tpu.memory_space<vmem>>) attributes {dimension_semantics = [], scalar_prefetch = 0 : i64, scratch_operands = 0 : i64, tpu.core_type = #tpu.core_type<tc>} {
    %c0 = arith.constant 0 : index
    %c0_0 = arith.constant 0 : index
    %0 = vector.load %arg0[%c0, %c0_0] : memref<8x32xf32, #tpu.memory_space<vmem>>, vector<8x32xf32>
    %c0_1 = arith.constant 0 : index
    %c0_2 = arith.constant 0 : index
    %1 = vector.load %arg1[%c0_1, %c0_2] : memref<32x2xf32, #tpu.memory_space<vmem>>, vector<32x2xf32>
    %cst = arith.constant dense<0.000000e+00> : vector<8x2xf32>
    %2 = tpu.matmul %0, %1, %cst {dimension_numbers = #tpu.dot_dimension_numbers<[1], [0], [0], [1], [0, 0, 1, 1], [], []>} : vector<8x32xf32>, vector<32x2xf32>, vector<8x2xf32> -> vector<8x2xf32>
    %c0_3 = arith.constant 0 : index
    %c0_4 = arith.constant 0 : index
    %3 = vector.load %arg2[%c0_3, %c0_4] : memref<1x2xf32, #tpu.memory_space<vmem>>, vector<1x2xf32>
    %4 = vector.broadcast %3 : vector<1x2xf32> to vector<8x2xf32>
    %5 = arith.addf %2, %4 : vector<8x2xf32>
    %c0_5 = arith.constant 0 : index
    %c0_6 = arith.constant 0 : index
    %6 = vector.load %arg3[%c0_5, %c0_6] : memref<8x2xf32, #tpu.memory_space<vmem>>, vector<8x2xf32>
    tpu.vector_store %arg3[%c0_5, %c0_6], %5 {strides = array<i32>} : memref<8x2xf32, #tpu.memory_space<vmem>>, vector<8x2xf32>,
    return
  }
}

</mosaic_0001>

<bundles_post_ra>
// kernel: tpu_custom_call.1
= control target key start
LH: loop header
LB: loop body
LE: loop exit
PB: predicated region body
PF: predicated region fallthrough
CT: control target
= control target key end

     0   :  { %v133_v0 = vmov 0.0|0.0   ;;  %vm134_vm0 = vmmov 0   ;;  %v135_v4 = vmov 0.0   ;;  %vm26_vm1 = vcmask 261120   ;;  %s177_s1 = inlined_call_operand.vmem [shape: f32[32,2], index: 1, kind: input, shape index: {}]   ;;  %s178_s0 = inlined_call_operand.vmem [shape: f32[8,32], index: 0, kind: input, shape index: {}]   ;;  %s179_s2 = inlined_call_operand.vmem [shape: f32[1,2], index: 2, kind: input, shape index: {}]   ;;  %s180_s3 = inlined_call_operand.vmem [shape: f32[8,2], index: 3, kind: output, shape index: {}]  }
   0x1   :  { %124 = vmatprep.subr.bf16.mxu0 %v133_v0  ;;  %v15_v1 = vld [vmem:[%s177_s1] sm:$0xff]  ;;  %v16_v2 = vld [vmem:[%s177_s1 + $0x8] sm:$0xff]  ;;  %v17_v3 = vld [vmem:[%s177_s1 + $0x10] sm:$0xff]  ;;  %121 = vmatprep.mubr.msk.f32.mxu0 %vm134_vm0, %v135_v4  ;;  %vm100_vm2 = vcmask 15360  }
   0x2   :  { %v125_v5 = vpack.c.bf16 %v16_v2, %v15_v1  ;;  %v18_v6 = vld [vmem:[%s177_s1 + $0x18] sm:$0xff]  ;;  %v14_v8 = vld [vmem:[%s178_s0] sm:$0xff] }
   0x3   :  { %v128_v7 = vpack.c.bf16 %v18_v6, %v17_v3  ;;  %v106_v9 = vld [vmem:[%s179_s2] ss:$0 sm:$0xff] }
   0x4   :  { %126 = vmatpush3.bf16.msra.mxu0 %v125_v5 }
   0x5   :  { %127 = vmatprep.subr.bf16.mxu0 %v133_v0 }
   0x8   :  { %129 = vmatpush3.bf16.msra.mxu0 %v128_v7 }
   0xb   :  { %122 = vmatmul.mubr.msk.f32.vlgmr.msra.gmra.mrb[0].mxu0 %vm26_vm1, %v14_v8 }
  0xde   :  { %v96_v10 = vpop.f32.mrb[0].mxu0 }
  0xdf   :  { %v97_v11 = vadd.f32 %v106_v9, %v96_v10  ;;  %v123_v12 = vpop.f32.mrb[1].mxu0 }
  0xe1   :  { %101 = vst.msk [vmem:[%s180_s3] sm:$0xff] %vm100_vm2, %v97_v11 }

</bundles_post_ra>
